<compile_context>
chip_gen: v6e
topology: v6e:2x2x1
jax: 0.10.0
libtpu: 0.0.40
codegen_flags: <defaults>
</compile_context>

<pallas_src>
import jax
import jax.numpy as jnp
from jax.experimental import pallas as pl
from jax.experimental.pallas import tpu as pltpu

_SUBLANE = 8


def _mlp_feature_kernel(x_ref, w1_ref, b1_ref, w2_ref, b2_ref, o_ref):
    # Fused Linear -> ReLU -> Linear -> ReLU; MXU matmuls with f32 accumulation.
    x = x_ref[...]
    h = jnp.dot(x, w1_ref[...], preferred_element_type=jnp.float32) + b1_ref[...]
    h = jnp.maximum(h, 0.0)
    # Keep the MXU LHS in the activation dtype (matters for bf16 on v5e/v6e;
    # a no-op when activations are already f32).
    h = h.astype(x.dtype)
    y = jnp.dot(h, w2_ref[...], preferred_element_type=jnp.float32) + b2_ref[...]
    y = jnp.maximum(y, 0.0)
    o_ref[...] = y.astype(o_ref.dtype)


def _round_up(x, m):
    return ((x + m - 1) // m) * m


def _choose_batch_tile(batch, block_batch):
    """Batch tile: multiple of 8 sublanes (or == batch), capped at block_batch,
    and split into >=2 grid steps when possible so v7x's two TensorCores both
    get work under dimension_semantics=("parallel",)."""
    if batch < 2 * _SUBLANE:
        # Too small to split into >=2 multiple-of-8 tiles; one full-extent block.
        return batch
    n_steps = max(2, pl.cdiv(batch, block_batch))
    tb = _round_up(pl.cdiv(batch, n_steps), _SUBLANE)
    return min(tb, block_batch)


def custom_model_forward(x, w1, b1, w2, b2, *, block_batch=2048):
    """Pallas TPU implementation of CustomModel.forward (backbone minus head).

    x: (batch, in_dim); w1: (in_dim, hid); w2: (hid, out_dim);
    b1/b2: (hid,)/(out_dim,) or (1, hid)/(1, out_dim).
    """
    batch, in_dim = x.shape
    hid = w1.shape[1]
    out_dim = w2.shape[1]

    # Explicitly make biases 2D (1, N) so in-kernel broadcast is intentional,
    # not accidental (handles 1D PyTorch-style bias vectors).
    b1 = b1.reshape(1, hid)
    b2 = b2.reshape(1, out_dim)

    tb = _choose_batch_tile(batch, block_batch)
    grid = (pl.cdiv(batch, tb),)  # ragged last block: masked on store

    return pl.pallas_call(
        _mlp_feature_kernel,
        out_shape=jax.ShapeDtypeStruct((batch, out_dim), x.dtype),
        grid=grid,
        in_specs=[
            # x: tiled along batch; feature dim = full array extent (no padding).
            pl.BlockSpec((tb, in_dim), lambda i: (i, 0)),
            # Weights/biases: full-extent blocks, constant index_map -> DMA'd
            # once and resident in VMEM for the whole grid.
            pl.BlockSpec((in_dim, hid), lambda i: (0, 0)),
            pl.BlockSpec((1, hid), lambda i: (0, 0)),
            pl.BlockSpec((hid, out_dim), lambda i: (0, 0)),
            pl.BlockSpec((1, out_dim), lambda i: (0, 0)),
        ],
        out_specs=pl.BlockSpec((tb, out_dim), lambda i: (i, 0)),
        compiler_params=pltpu.CompilerParams(
            dimension_semantics=("parallel",)),
    )(x, w1, b1, w2, b2)


def _reference_forward(x, w1, b1, w2, b2):
    h = jnp.maximum(x @ w1 + b1, 0.0)
    return jnp.maximum(h @ w2 + b2, 0.0)


if __name__ == "__main__":
    key = jax.random.PRNGKey(0)
    k_x, k_w1, k_b1, k_w2, k_b2, k_x2 = jax.random.split(key, 6)

    batch, in_dim, hid, feat_dim = 8, 32, 64, 32  # feature-extractor output = 32

    x = jax.random.normal(k_x, (batch, in_dim), dtype=jnp.float32)
    # Deterministic "Linear" parameters (synthetic init, ~Kaiming-ish scale).
    w1 = jax.random.normal(k_w1, (in_dim, hid), dtype=jnp.float32) * (1.0 / jnp.sqrt(in_dim))
    b1 = jax.random.normal(k_b1, (hid,), dtype=jnp.float32) * 0.01
    w2 = jax.random.normal(k_w2, (hid, feat_dim), dtype=jnp.float32) * (1.0 / jnp.sqrt(hid))
    b2 = jax.random.normal(k_b2, (feat_dim,), dtype=jnp.float32) * 0.01
    # NOTE: the dropped head Linear(32->10) has no parameters here because
    # CustomModel never executes it.

    # Small nominal case (single-block grid).
    out = jax.block_until_ready(custom_model_forward(x, w1, b1, w2, b2))
    ref = _reference_forward(x, w1, b1, w2, b2)
    assert out.shape == (batch, feat_dim)
    assert jnp.allclose(out, ref, atol=1e-5, rtol=1e-5)

    # Moderate ragged batch: exercises the multi-step parallel grid and the
    # masked partial last block.
    x2 = jax.random.normal(k_x2, (600, in_dim), dtype=jnp.float32)
    out2 = jax.block_until_ready(custom_model_forward(x2, w1, b1, w2, b2))
    ref2 = _reference_forward(x2, w1, b1, w2, b2)
    assert out2.shape == (600, feat_dim)
    assert jnp.allclose(out2, ref2, atol=1e-5, rtol=1e-5)

    print("KERNEL_OK")
</pallas_src>

<mosaic_0001>
module attributes {stable_mosaic.version = 11 : i64} {
  func.func @_mlp_feature_kernel(%arg0: i32, %arg1: memref<8x32xf32, #tpu.memory_space<vmem>>, %arg2: memref<32x64xf32, #tpu.memory_space<vmem>>, %arg3: memref<1x64xf32, #tpu.memory_space<vmem>>, %arg4: memref<64x32xf32, #tpu.memory_space<vmem>>, %arg5: memref<1x32xf32, #tpu.memory_space<vmem>>, %arg6: memref<8x32xf32, #tpu.memory_space<vmem>>) attributes {dimension_semantics = [#tpu.dimension_semantics<parallel>], iteration_bounds = array<i64: 1>, scalar_prefetch = 0 : i64, scratch_operands = 0 : i64, tpu.core_type = #tpu.core_type<tc>, window_params = [{transform_indices = @transform_0, window_bounds = array<i64: 8, 32>}, {pipeline_mode = #tpu.pipeline_mode<synchronous>, transform_indices = @transform_1, window_bounds = array<i64: 32, 64>}, {pipeline_mode = #tpu.pipeline_mode<synchronous>, transform_indices = @transform_2, window_bounds = array<i64: 1, 64>}, {pipeline_mode = #tpu.pipeline_mode<synchronous>, transform_indices = @transform_3, window_bounds = array<i64: 64, 32>}, {pipeline_mode = #tpu.pipeline_mode<synchronous>, transform_indices = @transform_4, window_bounds = array<i64: 1, 32>}, {transform_indices = @transform_5, window_bounds = array<i64: 8, 32>}]} {
    %c0 = arith.constant 0 : index
    %c0_0 = arith.constant 0 : index
    %0 = vector.load %arg1[%c0, %c0_0] : memref<8x32xf32, #tpu.memory_space<vmem>>, vector<8x32xf32>
    %c0_1 = arith.constant 0 : index
    %c0_2 = arith.constant 0 : index
    %1 = vector.load %arg2[%c0_1, %c0_2] : memref<32x64xf32, #tpu.memory_space<vmem>>, vector<32x64xf32>
    %cst = arith.constant dense<0.000000e+00> : vector<8x64xf32>
    %2 = tpu.matmul %0, %1, %cst {dimension_numbers = #tpu.dot_dimension_numbers<[1], [0], [0], [1], [0, 0, 1, 1], [], []>} : vector<8x32xf32>, vector<32x64xf32>, vector<8x64xf32> -> vector<8x64xf32>
    %c0_3 = arith.constant 0 : index
    %c0_4 = arith.constant 0 : index
    %3 = vector.load %arg3[%c0_3, %c0_4] : memref<1x64xf32, #tpu.memory_space<vmem>>, vector<1x64xf32>
    %4 = vector.broadcast %3 : vector<1x64xf32> to vector<8x64xf32>
    %5 = arith.addf %2, %4 : vector<8x64xf32>
    %cst_5 = arith.constant 0.000000e+00 : f32
    %6 = vector.broadcast %cst_5 : f32 to vector<8x64xf32>
    %7 = arith.maximumf %5, %6 : vector<8x64xf32>
    %c0_6 = arith.constant 0 : index
    %c0_7 = arith.constant 0 : index
    %8 = vector.load %arg4[%c0_6, %c0_7] : memref<64x32xf32, #tpu.memory_space<vmem>>, vector<64x32xf32>
    %cst_8 = arith.constant dense<0.000000e+00> : vector<8x32xf32>
    %9 = tpu.matmul %7, %8, %cst_8 {dimension_numbers = #tpu.dot_dimension_numbers<[1], [0], [0], [1], [0, 0, 1, 1], [], []>} : vector<8x64xf32>, vector<64x32xf32>, vector<8x32xf32> -> vector<8x32xf32>
    %c0_9 = arith.constant 0 : index
    %c0_10 = arith.constant 0 : index
    %10 = vector.load %arg5[%c0_9, %c0_10] : memref<1x32xf32, #tpu.memory_space<vmem>>, vector<1x32xf32>
    %11 = vector.broadcast %10 : vector<1x32xf32> to vector<8x32xf32>
    %12 = arith.addf %9, %11 : vector<8x32xf32>
    %cst_11 = arith.constant 0.000000e+00 : f32
    %13 = vector.broadcast %cst_11 : f32 to vector<8x32xf32>
    %14 = arith.maximumf %12, %13 : vector<8x32xf32>
    %c0_12 = arith.constant 0 : index
    %c0_13 = arith.constant 0 : index
    %15 = vector.load %arg6[%c0_12, %c0_13] : memref<8x32xf32, #tpu.memory_space<vmem>>, vector<8x32xf32>
    tpu.vector_store %arg6[%c0_12, %c0_13], %14 {strides = array<i32>} : memref<8x32xf32, #tpu.memory_space<vmem>>, vector<8x32xf32>,
    return
  }
  func.func @transform_0(%arg0: i32) -> (i32, i32) {
    %c0_i32 = arith.constant 0 : i32
    %c0_i32_0 = arith.constant 0 : i32
    return %arg0, %c0_i32 : i32, i32
  }
  func.func @transform_1(%arg0: i32) -> (i32, i32) {
    %c0_i32 = arith.constant 0 : i32
    %c0_i32_0 = arith.constant 0 : i32
    %c0_i32_1 = arith.constant 0 : i32
    return %c0_i32, %c0_i32_0 : i32, i32
  }
  func.func @transform_2(%arg0: i32) -> (i32, i32) {
    %c0_i32 = arith.constant 0 : i32
    %c0_i32_0 = arith.constant 0 : i32
    %c0_i32_1 = arith.constant 0 : i32
    return %c0_i32, %c0_i32_0 : i32, i32
  }
  func.func @transform_3(%arg0: i32) -> (i32, i32) {
    %c0_i32 = arith.constant 0 : i32
    %c0_i32_0 = arith.constant 0 : i32
    %c0_i32_1 = arith.constant 0 : i32
    return %c0_i32, %c0_i32_0 : i32, i32
  }
  func.func @transform_4(%arg0: i32) -> (i32, i32) {
    %c0_i32 = arith.constant 0 : i32
    %c0_i32_0 = arith.constant 0 : i32
    %c0_i32_1 = arith.constant 0 : i32
    return %c0_i32, %c0_i32_0 : i32, i32
  }
  func.func @transform_5(%arg0: i32) -> (i32, i32) {
    %c0_i32 = arith.constant 0 : i32
    %c0_i32_0 = arith.constant 0 : i32
    return %arg0, %c0_i32 : i32, i32
  }
}

</mosaic_0001>

<bundles_post_ra>
// kernel: tpu_custom_call.1
= control target key start
LH: loop header
LB: loop body
LE: loop exit
PB: predicated region body
PF: predicated region fallthrough
CT: control target
= control target key end

     0   :  { %v286_v1 = vmov 0.0   ;;  %vm287_vm0 = vmmov 0   ;;  %s371_s0 = inlined_call_operand.vmem [shape: f32[8,32], index: 0, kind: input, shape index: {}]   ;;  %s372_s1 = inlined_call_operand.vmem [shape: f32[32,64], index: 1, kind: input, shape index: {}]   ;;  %s373_s2 = inlined_call_operand.vmem [shape: f32[1,64], index: 2, kind: input, shape index: {}]   ;;  %s374_s3 = inlined_call_operand.vmem [shape: f32[64,32], index: 3, kind: input, shape index: {}]   ;;  %s375_s4 = inlined_call_operand.vmem [shape: f32[1,32], index: 4, kind: input, shape index: {}]   ;;  %s376_s5 = inlined_call_operand.hbm [shape: f32[8,32], index: 5, kind: output, shape index: {}]  }
   0x1   :  { %v25_v0 = vld [vmem:[%s372_s1 + $0x18] sm:$0xff]  ;;  %231 = vmatprep.subr.mxu0 %v286_v1  ;;  %v24_v2 = vld [vmem:[%s372_s1 + $0x10] sm:$0xff]  ;;  %239 = vmatprep.mubr.msk.f32.mxu0 %vm287_vm0, %v286_v1  ;;  %v23_v5 = vld [vmem:[%s372_s1 + $0x8] sm:$0xff] }
   0x2   :  { %v115_v3 = vld [vmem:[%s374_s3 + $0x38] sm:$0xff]  ;;  %232 = vmatpush3.msra.mxu0 %v25_v0  ;;  %242 = vmatprep.subr.mxu1 %v286_v1  ;;  %v114_v4 = vld [vmem:[%s374_s3 + $0x30] sm:$0xff] }
   0x3   :  { %233 = vmatprep.subr.mxu0 %v286_v1  ;;  %243 = vmatpush3.msra.mxu1 %v115_v3 }
   0x4   :  { %10 = vsyncpa [#allocation3], 0  ;;  %234 = vmatpush3.msra.mxu0 %v24_v2  ;;  %244 = vmatprep.subr.mxu1 %v286_v1  ;;  %v113_v6 = vld [vmem:[%s374_s3 + $0x28] sm:$0xff]  ;;  %v22_v7 = vld [vmem:[%s372_s1] sm:$0xff]  ;;  %vm33_vm1 = vcmask 261120   ;;  %vm123_vm2 = vcmask 523264  }
   0x5   :  { %235 = vmatprep.subr.mxu0 %v286_v1  ;;  %245 = vmatpush3.msra.mxu1 %v114_v4  ;;  %v21_v8 = vld [vmem:[%s371_s0] sm:$0xff]  ;;  %v111_v10 = vld [vmem:[%s374_s3 + $0x18] sm:$0xff]  ;;  %v110_v11 = vld [vmem:[%s374_s3 + $0x10] sm:$0xff]  ;;  %s288_s21 = smov [#allocation2]  }
   0x6   :  { %236 = vmatpush3.msra.mxu0 %v23_v5  ;;  %246 = vmatprep.subr.mxu1 %v286_v1  ;;  %v112_v9 = vld [vmem:[%s374_s3 + $0x20] sm:$0xff]  ;;  %v109_v12 = vld [vmem:[%s374_s3 + $0x8] sm:$0xff]  ;;  %s205_s22 = sshll.u32 %s288_s21, 4  ;;  %s206_s22 = int_to_ptr.vmem [resolvable:$true] %s205_s22 }
   0x7   :  { %237 = vmatprep.subr.mxu0 %v286_v1  ;;  %247 = vmatpush3.msra.mxu1 %v113_v6  ;;  %v108_v13 = vld [vmem:[%s374_s3] sm:$0xff]  ;;  %p269_p1 = scmp.lt.s32.totalorder %s206_s22, %s206_s22 }
   0x8   :  { %238 = vmatpush3.msra.mxu0 %v22_v7  ;;  %248 = vmatprep.subr.mxu1 %v286_v1  ;;  %v213_v14 = vld [vmem:[%s373_s2] ss:$0 sm:$0xff]  ;;  %s264_s2 = scalar_lea.vmem %s206_s22, 128 }
   0x9   :  { %240 = vmatmul.mubr.msk.f32.vlgmr.msra.gmra.mxu0 %vm33_vm1, %v21_v8  ;;  %249 = vmatpush3.msra.mxu1 %v112_v9  ;;  %v215_v19 = vld [vmem:[%s375_s4] ss:$0 sm:$0xff]  ;;  %p265_p0 = scmp.ne.s32.totalorder %s206_s22, %s264_s2  ;;  %p270_p2 = scmp.lt.s32.totalorder %s264_s2, %s264_s2 }
   0xa   :  { %250 = vmatprep.subr.mxu1 %v286_v1  ;;  %258 = vmatprep.mubr.msk.f32.mxu1 %vm287_vm0, %v286_v1 }
   0xb   :  { %251 = vmatpush3.msra.mxu1 %v111_v10  ;;  %p271_p3 = por %p270_p2, %p269_p1 }
   0xc   :  { %252 = vmatprep.subr.mxu1 %v286_v1 }
   0xd   :  { %253 = vmatpush3.msra.mxu1 %v110_v11  ;;  %p272_p4 = pnand %p271_p3, %p265_p0 }
   0xe   :  { %254 = vmatprep.subr.mxu1 %v286_v1 }
   0xf   :  { %255 = vmatpush3.msra.mxu1 %v109_v12 }
  0x10   :  { %256 = vmatprep.subr.mxu1 %v286_v1 }
  0x11   :  { %257 = vmatpush3.msra.mxu1 %v108_v13 }
  0xc9   :  { %v103_v15 = vpop.f32.mrf.mxu0 }
  0xca   :  { %v104_v16 = vadd.f32 %v213_v14, %v103_v15 }
  0xcb   :  { %v241_v17 = vpop.f32.mrf.mxu0 }
  0xcc   :  { %v107_v18 = vmax.f32 %v104_v16, 0.0 }
  0xce   :  { %259 = vmatmul.mubr.msk.f32.vlgmr.msra.gmra.mxu1 %vm123_vm2, %v107_v18 }
 0x18e   :  { %v193_v20 = vpop.f32.mrf.mxu1 }
 0x18f   :  { %v194_v21 = vadd.f32 %v215_v19, %v193_v20 }
 0x190   :  { %v260_v22 = vpop.f32.mrf.mxu1 }
 0x191   :  { %v197_v23 = vmax.f32 %v194_v21, 0.0 }
 0x193   :  { %198 = vst.msk [vmem:[#allocation2] sm:$0xff] %vm33_vm1, %v197_v23 }
 0x194   :  { %275 = shalt.err (!%p272_p4)
}
 0x195   :  { %208 = dma.vmem_to_hbm [thread:$0]  %s206_s22, 128, %s376_s5, [#allocation3]  }
 0x196   :  { %284 = dma.done.wait [#allocation3], 128  }
 0x197   :  { %285 = vsyncadd [#allocation3], 4294967168 }
 0x198   :  { %212 = vsyncpa [#allocation3], 1 }

</bundles_post_ra>
